<compile_context>
chip_gen: v5e
topology: v5e:2x2
jax: 0.10.0
libtpu: 0.0.40
codegen_flags: <defaults>
</compile_context>

<pallas_src>
import functools

import jax
import jax.numpy as jnp
from jax import lax
from jax.experimental import pallas as pl
from jax.experimental.pallas import tpu as pltpu


# Contraction width at which a per-tap matmul already fills the MXU (128 on v5e,
# 256 on v6e/v7x): above this, skip the im2col slab entirely.
_DIRECT_PATH_MIN_CHANNELS = 128


# ----------------------------------------------------------------------------
# Fused kernel: `bsub` batch elements per grid step, all layers in VMEM/vregs
# ----------------------------------------------------------------------------
def _tcn_fused_kernel(x_ref, w0_ref, w1s_ref, w2s_ref, wf_ref, shifts_ref, bf_ref, o_ref,
                      *, K, c_in, channels, num_block, bsub, dilations, pads, t_outs):
    """Refs:
      x_ref:      (bsub, c_in, T)        input tile (bsub batch elements)
      w0_ref:     (C, K*c_in)            bf16, BN-scale-folded, im2col layout
      w1s_ref:    (nb, C, K*C)           bf16, stacked per-block conv1 weights
      w2s_ref:    (nb, C, C)             bf16, stacked per-block 1x1 conv weights
      wf_ref:     (c_out, C)             bf16, final 1x1 conv
      shifts_ref: (C, 1+2*nb)            f32 BN shifts (col 0: first block; 1+2i / 2+2i)
      bf_ref:     (c_out, 1)             f32 final conv bias
      o_ref:      (1, c_out, bsub*t_fin) lane-dense output slab

    Batch element b occupies columns [b*t_cur, (b+1)*t_cur) of every activation value.
    All loops are static (unrolled); activations are f32 values, matmul operands bf16.
    """
    f32 = jnp.float32
    cdt = w0_ref.dtype   # matmul operand dtype (bf16); accumulation is f32

    def band_cat(parts):
        return parts[0] if len(parts) == 1 else jnp.concatenate(parts, axis=1)

    def conv_layer(w, rhs_tap, c_contr, t_out):
        """Dilated conv as matmul(s).  rhs_tap(k) -> (c_contr, bsub*t_out) f32 value."""
        if c_contr < _DIRECT_PATH_MIN_CHANNELS:
            # Small contraction: build the im2col slab as a value -> one MXU-filling
            # matmul with contraction K*c_contr (no VMEM scratch round-trip).
            slab = jnp.concatenate([rhs_tap(k) for k in range(K)], axis=0).astype(cdt)
            return jnp.dot(w[...], slab, preferred_element_type=f32)
        # Wide channels already fill the MXU per tap: K accumulating matmuls, no slab.
        acc = jnp.zeros((channels, bsub * t_out), f32)
        for k in range(K):
            acc = acc + jnp.dot(w[:, k * c_contr:(k + 1) * c_contr],
                                rhs_tap(k).astype(cdt), preferred_element_type=f32)
        return acc

    # ---- FirstTemporalBlock: dilated conv -> (+BN shift) -> ReLU -------------------
    d, t_out = dilations[0], t_outs[0]

    def tap0(k, _d=d, _t=t_out):
        return band_cat([x_ref[b, :, k * _d:k * _d + _t] for b in range(bsub)])

    h = conv_layer(w0_ref, tap0, c_in, t_out)
    h = jnp.maximum(h + shifts_ref[:, 0:1], 0.0)
    t_prev = t_out

    # ---- TemporalBlocks: conv1 -> ReLU -> 1x1 conv -> ReLU -> + trimmed residual ---
    for i in range(num_block):
        d, t_out, pad = dilations[i + 1], t_outs[i + 1], pads[i]
        h_cur = h   # block input (f32 value); residual and taps both read this

        def tap(k, _h=h_cur, _tp=t_prev, _d=d, _t=t_out):
            return band_cat([_h[:, b * _tp + k * _d: b * _tp + k * _d + _t]
                             for b in range(bsub)])

        res = band_cat([h_cur[:, b * t_prev + pad: b * t_prev + pad + t_out]
                        for b in range(bsub)])

        t1 = conv_layer(w1s_ref[i], tap, channels, t_out)
        t1 = jnp.maximum(t1 + shifts_ref[:, 1 + 2 * i:2 + 2 * i], 0.0)
        t2 = jnp.dot(w2s_ref[i], t1.astype(cdt), preferred_element_type=f32)
        t2 = jnp.maximum(t2 + shifts_ref[:, 2 + 2 * i:3 + 2 * i], 0.0)
        h = t2 + res
        t_prev = t_out

    # ---- Final nn.Conv1d(channels, num_joint_3d*3, 1) with bias ---------------------
    y = jnp.dot(wf_ref[...], h.astype(cdt), preferred_element_type=f32) + bf_ref[...]
    o_ref[0] = y.astype(o_ref.dtype)   # single lane-dense (c_out, bsub*t_fin) store


# ----------------------------------------------------------------------------
# Parameters (mirroring module __init__: conv weights ~ N(0, 0.01), fresh BN eval
# stats, final Conv1d with bias)
# ----------------------------------------------------------------------------
def bn_eval_affine(channels, eps=1e-5):
    gamma = jnp.ones((channels, 1), jnp.float32)
    beta = jnp.zeros((channels, 1), jnp.float32)
    r_mean = jnp.zeros((channels, 1), jnp.float32)
    r_var = jnp.ones((channels, 1), jnp.float32)
    scale = gamma / jnp.sqrt(r_var + eps)
    shift = beta - r_mean * scale
    return scale, shift


def make_params(key, c_in, channels, num_joint_3d, kernel_size, num_block):
    keys = jax.random.split(key, 2 * num_block + 3)
    params = {}
    params["w0"] = 0.01 * jax.random.normal(keys[0], (channels, c_in, kernel_size), jnp.float32)
    params["s0"], params["b0"] = bn_eval_affine(channels)
    blocks = []
    for i in range(num_block):
        w1 = 0.01 * jax.random.normal(keys[1 + 2 * i], (channels, channels, kernel_size), jnp.float32)
        w2 = 0.01 * jax.random.normal(keys[2 + 2 * i], (channels, channels, 1), jnp.float32)
        s1, b1 = bn_eval_affine(channels)
        s2, b2 = bn_eval_affine(channels)
        blocks.append(dict(w1=w1, s1=s1, b1=b1, w2=w2, s2=s2, b2=b2))
    params["blocks"] = blocks
    c_out = num_joint_3d * 3
    bound = 1.0 / (channels ** 0.5)
    params["wf"] = jax.random.uniform(keys[-2], (c_out, channels), jnp.float32, -bound, bound)
    params["bf"] = jax.random.uniform(keys[-1], (c_out, 1), jnp.float32, -bound, bound)
    return params


def prepare_params(params, kernel_size, weight_dtype=jnp.bfloat16):
    """One-time inference prep: fold BN scale into conv weights, im2col weight layout,
    stack per-block weights and per-layer shifts, cast weights to bf16 (shifts stay f32)."""
    K = kernel_size

    def im2col_weight(w, scale):
        # w: (C_out, C_in, K); fold per-output-channel BN scale, then reorder so weight
        # column k*C_in + i matches im2col slab row k*C_in + i.
        wf = w * scale[:, :, None]
        return jnp.transpose(wf, (0, 2, 1)).reshape(w.shape[0], K * w.shape[1])

    blocks = params["blocks"]
    assert len(blocks) >= 1, "kernel path assumes num_block >= 1"
    w1s = jnp.stack([im2col_weight(b["w1"], b["s1"]) for b in blocks])      # (nb, C, K*C)
    w2s = jnp.stack([b["w2"][:, :, 0] * b["s2"] for b in blocks])           # (nb, C, C)
    shifts = jnp.concatenate(
        [params["b0"]] + [s for b in blocks for s in (b["b1"], b["b2"])], axis=1)  # (C, 1+2nb)
    return {
        "w0": im2col_weight(params["w0"], params["s0"]).astype(weight_dtype),
        "w1s": w1s.astype(weight_dtype),
        "w2s": w2s.astype(weight_dtype),
        "wf": params["wf"].astype(weight_dtype),
        "shifts": shifts.astype(jnp.float32),
        "bf": params["bf"].astype(jnp.float32),
    }


# ----------------------------------------------------------------------------
# Full forward: glue in plain JAX, the whole hot path is ONE pallas_call
# ----------------------------------------------------------------------------
def temporal_conv_net_forward(x, prep, *, kernel_size, init_dilation, num_block,
                              num_joint_3d, batch_per_step=None):
    B, T = x.shape[0], x.shape[1]
    xc = jnp.transpose(x.reshape(B, T, -1), (0, 2, 1)).astype(jnp.float32)   # (B, c_in, T)
    c_in = xc.shape[1]
    channels = prep["w0"].shape[0]
    c_out = prep["wf"].shape[0]
    K = kernel_size

    # Fold the whole batch into the matmul lane axis by default (grid=(1,)).  On a
    # v7x megacore, pass batch_per_step=B//2 to keep two "parallel" grid steps.
    bsub = B if batch_per_step is None else batch_per_step
    assert B % bsub == 0
    G = B // bsub

    # Static per-layer schedule (dilation, residual trim, output length).
    dilations = [init_dilation]
    d = init_dilation
    for _ in range(num_block):
        d *= K
        dilations.append(d)
    pads = [(K - 1) * dd // 2 for dd in dilations[1:]]
    t_outs, t_cur = [], T
    for dd in dilations:
        t_cur = t_cur - (K - 1) * dd
        t_outs.append(t_cur)
    assert t_outs[-1] > 0, "sequence too short for this dilation schedule"
    t_fin = t_outs[-1]

    inputs = [xc, prep["w0"], prep["w1s"], prep["w2s"], prep["wf"], prep["shifts"], prep["bf"]]

    def invariant_spec(arr):
        nd = arr.ndim
        imap = lambda g: (0,) * nd
        try:   # grid-invariant operand: single-buffer it (block index never changes)
            return pl.BlockSpec(arr.shape, imap, pipeline_mode=pl.Buffered(1))
        except (TypeError, AttributeError):
            return pl.BlockSpec(arr.shape, imap)

    in_specs = [pl.BlockSpec((bsub, c_in, T), lambda g: (g, 0, 0))]
    in_specs += [invariant_spec(a) for a in inputs[1:]]
    out_specs = pl.BlockSpec((1, c_out, bsub * t_fin), lambda g: (g, 0, 0))

    # VMEM budget sized from the actual footprint (weights, I/O blocks, activations),
    # never below the 32 MiB scoped default so it can only relax the limit.
    weight_bytes = sum(int(a.size) * a.dtype.itemsize for a in inputs[1:])
    io_bytes = 4 * (bsub * c_in * T + c_out * bsub * t_fin)
    act_bytes = 4 * channels * bsub * t_outs[0] * (K + 4)
    est = 2 * (weight_bytes + io_bytes) + act_bytes + (8 << 20)
    vmem_limit = int(min(112 << 20, max(32 << 20, est)))

    kernel = functools.partial(
        _tcn_fused_kernel, K=K, c_in=c_in, channels=channels, num_block=num_block,
        bsub=bsub, dilations=tuple(dilations), pads=tuple(pads), t_outs=tuple(t_outs))

    out = pl.pallas_call(
        kernel,
        out_shape=jax.ShapeDtypeStruct((G, c_out, bsub * t_fin), jnp.float32),
        grid=(G,),
        in_specs=in_specs,
        out_specs=out_specs,
        compiler_params=pltpu.CompilerParams(
            dimension_semantics=("parallel",),     # grid steps are independent batches
            vmem_limit_bytes=vmem_limit),
    )(*inputs)

    # Tiny output reshuffle in the wrapper; the kernel-side store is lane-dense.
    out = out.reshape(G, c_out, bsub, t_fin)
    out = jnp.transpose(out, (0, 2, 3, 1))          # (G, bsub, t_fin, c_out)
    return out.reshape(B, t_fin, num_joint_3d, 3)


# ----------------------------------------------------------------------------
# Pure-JAX reference (correctness check only), built from the RAW f32 params
# ----------------------------------------------------------------------------
def reference_forward(x, params, *, kernel_size, init_dilation, num_block, num_joint_3d):
    B, T = x.shape[0], x.shape[1]
    h = jnp.transpose(x.reshape(B, T, -1), (0, 2, 1))

    def conv(z, w, d):
        return lax.conv_general_dilated(z, w, (1,), "VALID", rhs_dilation=(d,),
                                        dimension_numbers=("NCH", "OIH", "NCH"))

    def bn_relu(z, s, b):
        return jnp.maximum(z * s[None] + b[None], 0.0)

    h = bn_relu(conv(h, params["w0"], init_dilation), params["s0"], params["b0"])
    dilation = init_dilation
    for i in range(num_block):
        dilation *= kernel_size
        pad = (kernel_size - 1) * dilation // 2
        p = params["blocks"][i]
        res = h[:, :, pad:h.shape[2] - pad]
        t = bn_relu(conv(h, p["w1"], dilation), p["s1"], p["b1"])
        t = bn_relu(conv(t, p["w2"], 1), p["s2"], p["b2"])
        h = t + res
    h = conv(h, params["wf"][:, :, None], 1) + params["bf"][None]
    h = jnp.transpose(h, (0, 2, 1))
    return h.reshape(B, -1, num_joint_3d, 3)


if __name__ == "__main__":
    # Small hyperparameters consistent with the module
    num_joint_2d, in_features, num_joint_3d = 4, 2, 4
    kernel_size, init_dilation, num_block, channels = 3, 1, 2, 32
    B, T = 2, 32                                   # T large enough for two dilated blocks
    c_in = num_joint_2d * in_features

    key = jax.random.PRNGKey(0)
    kx, kp = jax.random.split(key)
    x = jax.random.normal(kx, (B, T, num_joint_2d, in_features), jnp.float32)
    params = make_params(kp, c_in, channels, num_joint_3d, kernel_size, num_block)
    prep = prepare_params(params, kernel_size)     # BN fold, bf16 weights, stacking

    out = temporal_conv_net_forward(
        x, prep, kernel_size=kernel_size, init_dilation=init_dilation,
        num_block=num_block, num_joint_3d=num_joint_3d)
    out = jax.block_until_ready(out)

    ref = reference_forward(
        x, params, kernel_size=kernel_size, init_dilation=init_dilation,
        num_block=num_block, num_joint_3d=num_joint_3d)
    ref = jax.block_until_ready(ref)

    assert out.shape == ref.shape, (out.shape, ref.shape)
    # bf16 weights with f32 accumulation vs f32 reference: relative-error check
    # (outputs are tiny since conv weights are ~N(0, 0.01)).
    err = float(jnp.max(jnp.abs(out - ref)))
    scale = float(jnp.max(jnp.abs(ref)))
    assert err <= 2e-2 * scale + 1e-5, (err, scale)
    # TODO(synk): training-mode BatchNorm (batch statistics + running-stat update) and
    # dropout masks are not implemented; the kernel reproduces eval-mode semantics.
    print("KERNEL_OK")
</pallas_src>

<mosaic_0001>
module attributes {stable_mosaic.version = 11 : i64} {
  func.func @_tcn_fused_kernel(%arg0: i32, %arg1: memref<2x8x32xf32, #tpu.memory_space<vmem>>, %arg2: memref<32x24xbf16, #tpu.memory_space<vmem>>, %arg3: memref<2x32x96xbf16, #tpu.memory_space<vmem>>, %arg4: memref<2x32x32xbf16, #tpu.memory_space<vmem>>, %arg5: memref<12x32xbf16, #tpu.memory_space<vmem>>, %arg6: memref<32x5xf32, #tpu.memory_space<vmem>>, %arg7: memref<12x1xf32, #tpu.memory_space<vmem>>, %arg8: memref<1x12x12xf32, #tpu.memory_space<vmem>>) attributes {dimension_semantics = [#tpu.dimension_semantics<parallel>], iteration_bounds = array<i64: 1>, scalar_prefetch = 0 : i64, scratch_operands = 0 : i64, tpu.core_type = #tpu.core_type<tc>, window_params = [{transform_indices = @transform_0, window_bounds = array<i64: 2, 8, 32>}, {pipeline_mode = #tpu.pipeline_mode<synchronous>, transform_indices = @transform_1, window_bounds = array<i64: 32, 24>}, {pipeline_mode = #tpu.pipeline_mode<synchronous>, transform_indices = @transform_2, window_bounds = array<i64: 2, 32, 96>}, {pipeline_mode = #tpu.pipeline_mode<synchronous>, transform_indices = @transform_3, window_bounds = array<i64: 2, 32, 32>}, {pipeline_mode = #tpu.pipeline_mode<synchronous>, transform_indices = @transform_4, window_bounds = array<i64: 12, 32>}, {pipeline_mode = #tpu.pipeline_mode<synchronous>, transform_indices = @transform_5, window_bounds = array<i64: 32, 5>}, {pipeline_mode = #tpu.pipeline_mode<synchronous>, transform_indices = @transform_6, window_bounds = array<i64: 12, 1>}, {transform_indices = @transform_7, window_bounds = array<i64: 1, 12, 12>}]} {
    %c0 = arith.constant 0 : index
    %c0_0 = arith.constant 0 : index
    %c0_1 = arith.constant 0 : index
    %0 = vector.load %arg1[%c0, %c0_0, %c0_1] : memref<2x8x32xf32, #tpu.memory_space<vmem>>, vector<1x8x30xf32>
    %1 = vector.shape_cast %0 : vector<1x8x30xf32> to vector<8x30xf32>
    %c1 = arith.constant 1 : index
    %c0_2 = arith.constant 0 : index
    %c0_3 = arith.constant 0 : index
    %2 = vector.load %arg1[%c1, %c0_2, %c0_3] : memref<2x8x32xf32, #tpu.memory_space<vmem>>, vector<1x8x30xf32>
    %3 = vector.shape_cast %2 : vector<1x8x30xf32> to vector<8x30xf32>
    %4 = tpu.concatenate %1, %3 in 1 : vector<8x30xf32>, vector<8x30xf32> -> vector<8x60xf32>
    %c0_4 = arith.constant 0 : index
    %c0_5 = arith.constant 0 : index
    %c1_6 = arith.constant 1 : index
    %5 = vector.load %arg1[%c0_4, %c0_5, %c1_6] : memref<2x8x32xf32, #tpu.memory_space<vmem>>, vector<1x8x30xf32>
    %6 = vector.shape_cast %5 : vector<1x8x30xf32> to vector<8x30xf32>
    %c1_7 = arith.constant 1 : index
    %c0_8 = arith.constant 0 : index
    %c1_9 = arith.constant 1 : index
    %7 = vector.load %arg1[%c1_7, %c0_8, %c1_9] : memref<2x8x32xf32, #tpu.memory_space<vmem>>, vector<1x8x30xf32>
    %8 = vector.shape_cast %7 : vector<1x8x30xf32> to vector<8x30xf32>
    %9 = tpu.concatenate %6, %8 in 1 : vector<8x30xf32>, vector<8x30xf32> -> vector<8x60xf32>
    %c0_10 = arith.constant 0 : index
    %c0_11 = arith.constant 0 : index
    %c2 = arith.constant 2 : index
    %10 = vector.load %arg1[%c0_10, %c0_11, %c2] : memref<2x8x32xf32, #tpu.memory_space<vmem>>, vector<1x8x30xf32>
    %11 = vector.shape_cast %10 : vector<1x8x30xf32> to vector<8x30xf32>
    %c1_12 = arith.constant 1 : index
    %c0_13 = arith.constant 0 : index
    %c2_14 = arith.constant 2 : index
    %12 = vector.load %arg1[%c1_12, %c0_13, %c2_14] : memref<2x8x32xf32, #tpu.memory_space<vmem>>, vector<1x8x30xf32>
    %13 = vector.shape_cast %12 : vector<1x8x30xf32> to vector<8x30xf32>
    %14 = tpu.concatenate %11, %13 in 1 : vector<8x30xf32>, vector<8x30xf32> -> vector<8x60xf32>
    %15 = tpu.concatenate %4, %9, %14 in 0 : vector<8x60xf32>, vector<8x60xf32>, vector<8x60xf32> -> vector<24x60xf32>
    %16 = arith.truncf %15 : vector<24x60xf32> to vector<24x60xbf16>
    %c0_15 = arith.constant 0 : index
    %c0_16 = arith.constant 0 : index
    %17 = vector.load %arg2[%c0_15, %c0_16] : memref<32x24xbf16, #tpu.memory_space<vmem>>, vector<32x24xbf16>
    %cst = arith.constant dense<0.000000e+00> : vector<32x60xf32>
    %18 = tpu.matmul %17, %16, %cst {dimension_numbers = #tpu.dot_dimension_numbers<[1], [0], [0], [1], [0, 0, 1, 1], [], []>} : vector<32x24xbf16>, vector<24x60xbf16>, vector<32x60xf32> -> vector<32x60xf32>
    %c0_17 = arith.constant 0 : index
    %c0_18 = arith.constant 0 : index
    %19 = vector.load %arg6[%c0_17, %c0_18] : memref<32x5xf32, #tpu.memory_space<vmem>>, vector<32x1xf32>
    %20 = vector.broadcast %19 : vector<32x1xf32> to vector<32x60xf32>
    %21 = arith.addf %18, %20 : vector<32x60xf32>
    %cst_19 = arith.constant 0.000000e+00 : f32
    %22 = vector.broadcast %cst_19 : f32 to vector<32x60xf32>
    %23 = arith.maximumf %21, %22 : vector<32x60xf32>
    %24 = vector.extract_strided_slice %23 {offsets = [0, 3], sizes = [32, 24], strides = [1, 1]} : vector<32x60xf32> to vector<32x24xf32>
    %25 = vector.extract_strided_slice %23 {offsets = [0, 33], sizes = [32, 24], strides = [1, 1]} : vector<32x60xf32> to vector<32x24xf32>
    %26 = tpu.concatenate %24, %25 in 1 : vector<32x24xf32>, vector<32x24xf32> -> vector<32x48xf32>
    %c0_20 = arith.constant 0 : index
    %c0_21 = arith.constant 0 : index
    %c0_22 = arith.constant 0 : index
    %27 = vector.load %arg3[%c0_20, %c0_21, %c0_22] : memref<2x32x96xbf16, #tpu.memory_space<vmem>>, vector<1x32x96xbf16>
    %28 = vector.shape_cast %27 : vector<1x32x96xbf16> to vector<32x96xbf16>
    %29 = vector.extract_strided_slice %23 {offsets = [0, 0], sizes = [32, 24], strides = [1, 1]} : vector<32x60xf32> to vector<32x24xf32>
    %30 = vector.extract_strided_slice %23 {offsets = [0, 30], sizes = [32, 24], strides = [1, 1]} : vector<32x60xf32> to vector<32x24xf32>
    %31 = tpu.concatenate %29, %30 in 1 : vector<32x24xf32>, vector<32x24xf32> -> vector<32x48xf32>
    %32 = vector.extract_strided_slice %23 {offsets = [0, 3], sizes = [32, 24], strides = [1, 1]} : vector<32x60xf32> to vector<32x24xf32>
    %33 = vector.extract_strided_slice %23 {offsets = [0, 33], sizes = [32, 24], strides = [1, 1]} : vector<32x60xf32> to vector<32x24xf32>
    %34 = tpu.concatenate %32, %33 in 1 : vector<32x24xf32>, vector<32x24xf32> -> vector<32x48xf32>
    %35 = vector.extract_strided_slice %23 {offsets = [0, 6], sizes = [32, 24], strides = [1, 1]} : vector<32x60xf32> to vector<32x24xf32>
    %36 = vector.extract_strided_slice %23 {offsets = [0, 36], sizes = [32, 24], strides = [1, 1]} : vector<32x60xf32> to vector<32x24xf32>
    %37 = tpu.concatenate %35, %36 in 1 : vector<32x24xf32>, vector<32x24xf32> -> vector<32x48xf32>
    %38 = tpu.concatenate %31, %34, %37 in 0 : vector<32x48xf32>, vector<32x48xf32>, vector<32x48xf32> -> vector<96x48xf32>
    %39 = arith.truncf %38 : vector<96x48xf32> to vector<96x48xbf16>
    %cst_23 = arith.constant dense<0.000000e+00> : vector<32x48xf32>
    %40 = tpu.matmul %28, %39, %cst_23 {dimension_numbers = #tpu.dot_dimension_numbers<[1], [0], [0], [1], [0, 0, 1, 1], [], []>} : vector<32x96xbf16>, vector<96x48xbf16>, vector<32x48xf32> -> vector<32x48xf32>
    %c0_24 = arith.constant 0 : index
    %c1_25 = arith.constant 1 : index
    %41 = vector.load %arg6[%c0_24, %c1_25] : memref<32x5xf32, #tpu.memory_space<vmem>>, vector<32x1xf32>
    %42 = vector.broadcast %41 : vector<32x1xf32> to vector<32x48xf32>
    %43 = arith.addf %40, %42 : vector<32x48xf32>
    %cst_26 = arith.constant 0.000000e+00 : f32
    %44 = vector.broadcast %cst_26 : f32 to vector<32x48xf32>
    %45 = arith.maximumf %43, %44 : vector<32x48xf32>
    %c0_27 = arith.constant 0 : index
    %c0_28 = arith.constant 0 : index
    %c0_29 = arith.constant 0 : index
    %46 = vector.load %arg4[%c0_27, %c0_28, %c0_29] : memref<2x32x32xbf16, #tpu.memory_space<vmem>>, vector<1x32x32xbf16>
    %47 = vector.shape_cast %46 : vector<1x32x32xbf16> to vector<32x32xbf16>
    %48 = arith.truncf %45 : vector<32x48xf32> to vector<32x48xbf16>
    %cst_30 = arith.constant dense<0.000000e+00> : vector<32x48xf32>
    %49 = tpu.matmul %47, %48, %cst_30 {dimension_numbers = #tpu.dot_dimension_numbers<[1], [0], [0], [1], [0, 0, 1, 1], [], []>} : vector<32x32xbf16>, vector<32x48xbf16>, vector<32x48xf32> -> vector<32x48xf32>
    %c0_31 = arith.constant 0 : index
    %c2_32 = arith.constant 2 : index
    %50 = vector.load %arg6[%c0_31, %c2_32] : memref<32x5xf32, #tpu.memory_space<vmem>>, vector<32x1xf32>
    %51 = vector.broadcast %50 : vector<32x1xf32> to vector<32x48xf32>
    %52 = arith.addf %49, %51 : vector<32x48xf32>
    %cst_33 = arith.constant 0.000000e+00 : f32
    %53 = vector.broadcast %cst_33 : f32 to vector<32x48xf32>
    %54 = arith.maximumf %52, %53 : vector<32x48xf32>
    %55 = arith.addf %54, %26 : vector<32x48xf32>
    %56 = vector.extract_strided_slice %55 {offsets = [0, 9], sizes = [32, 6], strides = [1, 1]} : vector<32x48xf32> to vector<32x6xf32>
    %57 = vector.extract_strided_slice %55 {offsets = [0, 33], sizes = [32, 6], strides = [1, 1]} : vector<32x48xf32> to vector<32x6xf32>
    %58 = tpu.concatenate %56, %57 in 1 : vector<32x6xf32>, vector<32x6xf32> -> vector<32x12xf32>
    %c1_34 = arith.constant 1 : index
    %c0_35 = arith.constant 0 : index
    %c0_36 = arith.constant 0 : index
    %59 = vector.load %arg3[%c1_34, %c0_35, %c0_36] : memref<2x32x96xbf16, #tpu.memory_space<vmem>>, vector<1x32x96xbf16>
    %60 = vector.shape_cast %59 : vector<1x32x96xbf16> to vector<32x96xbf16>
    %61 = vector.extract_strided_slice %55 {offsets = [0, 0], sizes = [32, 6], strides = [1, 1]} : vector<32x48xf32> to vector<32x6xf32>
    %62 = vector.extract_strided_slice %55 {offsets = [0, 24], sizes = [32, 6], strides = [1, 1]} : vector<32x48xf32> to vector<32x6xf32>
    %63 = tpu.concatenate %61, %62 in 1 : vector<32x6xf32>, vector<32x6xf32> -> vector<32x12xf32>
    %64 = vector.extract_strided_slice %55 {offsets = [0, 9], sizes = [32, 6], strides = [1, 1]} : vector<32x48xf32> to vector<32x6xf32>
    %65 = vector.extract_strided_slice %55 {offsets = [0, 33], sizes = [32, 6], strides = [1, 1]} : vector<32x48xf32> to vector<32x6xf32>
    %66 = tpu.concatenate %64, %65 in 1 : vector<32x6xf32>, vector<32x6xf32> -> vector<32x12xf32>
    %67 = vector.extract_strided_slice %55 {offsets = [0, 18], sizes = [32, 6], strides = [1, 1]} : vector<32x48xf32> to vector<32x6xf32>
    %68 = vector.extract_strided_slice %55 {offsets = [0, 42], sizes = [32, 6], strides = [1, 1]} : vector<32x48xf32> to vector<32x6xf32>
    %69 = tpu.concatenate %67, %68 in 1 : vector<32x6xf32>, vector<32x6xf32> -> vector<32x12xf32>
    %70 = tpu.concatenate %63, %66, %69 in 0 : vector<32x12xf32>, vector<32x12xf32>, vector<32x12xf32> -> vector<96x12xf32>
    %71 = arith.truncf %70 : vector<96x12xf32> to vector<96x12xbf16>
    %cst_37 = arith.constant dense<0.000000e+00> : vector<32x12xf32>
    %72 = tpu.matmul %60, %71, %cst_37 {dimension_numbers = #tpu.dot_dimension_numbers<[1], [0], [0], [1], [0, 0, 1, 1], [], []>} : vector<32x96xbf16>, vector<96x12xbf16>, vector<32x12xf32> -> vector<32x12xf32>
    %c0_38 = arith.constant 0 : index
    %c3 = arith.constant 3 : index
    %73 = vector.load %arg6[%c0_38, %c3] : memref<32x5xf32, #tpu.memory_space<vmem>>, vector<32x1xf32>
    %74 = vector.broadcast %73 : vector<32x1xf32> to vector<32x12xf32>
    %75 = arith.addf %72, %74 : vector<32x12xf32>
    %cst_39 = arith.constant 0.000000e+00 : f32
    %76 = vector.broadcast %cst_39 : f32 to vector<32x12xf32>
    %77 = arith.maximumf %75, %76 : vector<32x12xf32>
    %c1_40 = arith.constant 1 : index
    %c0_41 = arith.constant 0 : index
    %c0_42 = arith.constant 0 : index
    %78 = vector.load %arg4[%c1_40, %c0_41, %c0_42] : memref<2x32x32xbf16, #tpu.memory_space<vmem>>, vector<1x32x32xbf16>
    %79 = vector.shape_cast %78 : vector<1x32x32xbf16> to vector<32x32xbf16>
    %80 = arith.truncf %77 : vector<32x12xf32> to vector<32x12xbf16>
    %cst_43 = arith.constant dense<0.000000e+00> : vector<32x12xf32>
    %81 = tpu.matmul %79, %80, %cst_43 {dimension_numbers = #tpu.dot_dimension_numbers<[1], [0], [0], [1], [0, 0, 1, 1], [], []>} : vector<32x32xbf16>, vector<32x12xbf16>, vector<32x12xf32> -> vector<32x12xf32>
    %c0_44 = arith.constant 0 : index
    %c4 = arith.constant 4 : index
    %82 = vector.load %arg6[%c0_44, %c4] : memref<32x5xf32, #tpu.memory_space<vmem>>, vector<32x1xf32>
    %83 = vector.broadcast %82 : vector<32x1xf32> to vector<32x12xf32>
    %84 = arith.addf %81, %83 : vector<32x12xf32>
    %cst_45 = arith.constant 0.000000e+00 : f32
    %85 = vector.broadcast %cst_45 : f32 to vector<32x12xf32>
    %86 = arith.maximumf %84, %85 : vector<32x12xf32>
    %87 = arith.addf %86, %58 : vector<32x12xf32>
    %c0_46 = arith.constant 0 : index
    %c0_47 = arith.constant 0 : index
    %88 = vector.load %arg5[%c0_46, %c0_47] : memref<12x32xbf16, #tpu.memory_space<vmem>>, vector<12x32xbf16>
    %89 = arith.truncf %87 : vector<32x12xf32> to vector<32x12xbf16>
    %cst_48 = arith.constant dense<0.000000e+00> : vector<12x12xf32>
    %90 = tpu.matmul %88, %89, %cst_48 {dimension_numbers = #tpu.dot_dimension_numbers<[1], [0], [0], [1], [0, 0, 1, 1], [], []>} : vector<12x32xbf16>, vector<32x12xbf16>, vector<12x12xf32> -> vector<12x12xf32>
    %c0_49 = arith.constant 0 : index
    %c0_50 = arith.constant 0 : index
    %91 = vector.load %arg7[%c0_49, %c0_50] : memref<12x1xf32, #tpu.memory_space<vmem>>, vector<12x1xf32>
    %92 = vector.broadcast %91 : vector<12x1xf32> to vector<12x12xf32>
    %93 = arith.addf %90, %92 : vector<12x12xf32>
    %c0_51 = arith.constant 0 : index
    %c0_52 = arith.constant 0 : index
    %c0_53 = arith.constant 0 : index
    %94 = vector.load %arg8[%c0_51, %c0_52, %c0_53] : memref<1x12x12xf32, #tpu.memory_space<vmem>>, vector<1x12x12xf32>
    %95 = vector.shape_cast %94 : vector<1x12x12xf32> to vector<12x12xf32>
    %96 = vector.shape_cast %93 : vector<12x12xf32> to vector<1x12x12xf32>
    tpu.vector_store %arg8[%c0_51, %c0_52, %c0_53], %96 {strides = array<i32>} : memref<1x12x12xf32, #tpu.memory_space<vmem>>, vector<1x12x12xf32>,
    return
  }
  func.func @transform_0(%arg0: i32) -> (i32, i32, i32) {
    %c0_i32 = arith.constant 0 : i32
    %c0_i32_0 = arith.constant 0 : i32
    %c0_i32_1 = arith.constant 0 : i32
    return %arg0, %c0_i32, %c0_i32_0 : i32, i32, i32
  }
  func.func @transform_1(%arg0: i32) -> (i32, i32) {
    %c0_i32 = arith.constant 0 : i32
    %c0_i32_0 = arith.constant 0 : i32
    %c0_i32_1 = arith.constant 0 : i32
    return %c0_i32, %c0_i32_0 : i32, i32
  }
  func.func @transform_2(%arg0: i32) -> (i32, i32, i32) {
    %c0_i32 = arith.constant 0 : i32
    %c0_i32_0 = arith.constant 0 : i32
    %c0_i32_1 = arith.constant 0 : i32
    %c0_i32_2 = arith.constant 0 : i32
    return %c0_i32, %c0_i32_0, %c0_i32_1 : i32, i32, i32
  }
  func.func @transform_3(%arg0: i32) -> (i32, i32, i32) {
    %c0_i32 = arith.constant 0 : i32
    %c0_i32_0 = arith.constant 0 : i32
    %c0_i32_1 = arith.constant 0 : i32
    %c0_i32_2 = arith.constant 0 : i32
    return %c0_i32, %c0_i32_0, %c0_i32_1 : i32, i32, i32
  }
  func.func @transform_4(%arg0: i32) -> (i32, i32) {
    %c0_i32 = arith.constant 0 : i32
    %c0_i32_0 = arith.constant 0 : i32
    %c0_i32_1 = arith.constant 0 : i32
    return %c0_i32, %c0_i32_0 : i32, i32
  }
  func.func @transform_5(%arg0: i32) -> (i32, i32) {
    %c0_i32 = arith.constant 0 : i32
    %c0_i32_0 = arith.constant 0 : i32
    %c0_i32_1 = arith.constant 0 : i32
    return %c0_i32, %c0_i32_0 : i32, i32
  }
  func.func @transform_6(%arg0: i32) -> (i32, i32) {
    %c0_i32 = arith.constant 0 : i32
    %c0_i32_0 = arith.constant 0 : i32
    %c0_i32_1 = arith.constant 0 : i32
    return %c0_i32, %c0_i32_0 : i32, i32
  }
  func.func @transform_7(%arg0: i32) -> (i32, i32, i32) {
    %c0_i32 = arith.constant 0 : i32
    %c0_i32_0 = arith.constant 0 : i32
    %c0_i32_1 = arith.constant 0 : i32
    return %arg0, %c0_i32, %c0_i32_0 : i32, i32, i32
  }
}

</mosaic_0001>

<bundles_post_ra>
// kernel: tpu_custom_call.1
= control target key start
LH: loop header
LB: loop body
LE: loop exit
PB: predicated region body
PF: predicated region fallthrough
CT: control target
= control target key end

     0   :  { %12 = vsyncpa [#allocation3], 0  ;;  %s761_s27 = smov [#allocation2]   ;;  %s762_s29 = smov 128   ;;  %s1021_s0 = inlined_call_operand.hbm [shape: f32[2,8,32], index: 0, kind: input, shape index: {}]   ;;  %s1022_s1 = inlined_call_operand.vmem [shape: bf16[32,24], index: 1, kind: input, shape index: {}]   ;;  %s1023_s2 = inlined_call_operand.vmem [shape: bf16[2,32,96], index: 2, kind: input, shape index: {}]   ;;  %s1024_s3 = inlined_call_operand.vmem [shape: bf16[2,32,32], index: 3, kind: input, shape index: {}]   ;;  %s1025_s4 = inlined_call_operand.vmem [shape: bf16[12,32], index: 4, kind: input, shape index: {}]   ;;  %s1026_s5 = inlined_call_operand.vmem [shape: f32[32,5], index: 5, kind: input, shape index: {}]   ;;  %s1027_s6 = inlined_call_operand.vmem [shape: f32[12,1], index: 6, kind: input, shape index: {}]   ;;  %s1028_s7 = inlined_call_operand.vmem [shape: f32[1,12,12], index: 7, kind: output, shape index: {}]  }
   0x1   :  { %s17_s26 = sshll.u32 %s1021_s0, 4  ;;  %s19_s28 = sshll.u32 %s761_s27, 4  ;;  %s18_s26 = int_to_ptr.hbm [resolvable:$true] %s17_s26  ;;  %s20_s28 = int_to_ptr.vmem [resolvable:$true] %s19_s28 }
   0x2   :  { %s763_s30 = smov 8  }
   0x3   :  { %25 = dma.hbm_to_vmem [thread:$0]  %s18_s26, 256, %s20_s28, [#allocation3], %s762_s29, %s762_s29, %s763_s30  }
   0x4   :  { %759 = dma.done.wait [#allocation3], 256  }
   0x5   :  { %760 = vsyncadd [#allocation3], 4294967040  ;;  %v45_v0 = vld [vmem:[#allocation2 + $0x8] sm:$0xff]  ;;  %v43_v1 = vld [vmem:[#allocation2] sm:$0xff]  ;;  %s764_s8 = smov 30   ;;  %s765_s9 = smov 126  }
   0x6   :  { %47 = vrot.lane.b32.xlu1 %v45_v0, %s764_s8  ;;  %60 = vrot.lane.b32.xlu0 %v43_v1, %s765_s9  ;;  %s766_s10 = smov 29   ;;  %s767_s11 = smov 127   ;;  %v827_v2 = vld [vmem:[%s1026_s5] sm:$0xff]  ;;  %v832_v3 = vld [vmem:[%s1026_s5 + $0x18] sm:$0xff]  ;;  %v769_v4 = vmov 0   ;;  %vm50_vm0 = vcmask 244736  }
   0x7   :  { %56 = vrot.lane.b32.xlu2 %v45_v0, %s766_s10  ;;  %s768_s0 = smov 28   ;;  %679 = vset.pattern.permute.xlu1 %v769_v4  ;;  %v839_v5 = vld [vmem:[%s1026_s5 + $0x10] sm:$0xff]  ;;  %v848_v6 = vld [vmem:[%s1026_s5 + $0x8] sm:$0xff]  ;;  %vm114_vm1 = vcmask 1043456   ;;  %v644_v18 = vld [vmem:[%s1022_s1] sm:$0xff]  ;;  %vm107_vm2 = vcmask 195584  }
   0x8   :  { %678 = vset.pattern.permute.xlu0 %v769_v4  ;;  %677 = vset.pattern.permute.xlu2 %v769_v4  ;;  %v645_v19 = vld [vmem:[%s1022_s1 + $0x8] sm:$0xff]  ;;  %s770_s23 = smov 119   ;;  %s771_s1 = smov 125   ;;  %v774_v48 = vmov 1   ;;  %vm241_vm3 = vcmask 785408   ;;  %vm303_vm4 = vcmask 261120  }
   0x9   :  { %s772_s24 = smov 122   ;;  %s773_s25 = smov 116   ;;  %vm365_vm5 = vcmask 48128   ;;  %vm572_vm6 = vcmask 97280   ;;  %vm574_vm7 = vcmask 93184  }
   0xa   :  { %s778_s12 = smov 101  }
   0xe   :  { %53 = vrot.lane.b32.xlu1 %v43_v1, %s767_s11  ;;  %63 = vrot.lane.b32.xlu0 %v45_v0, %s768_s0  ;;  %s776_s11 = smov 92   ;;  %s777_s0 = smov 110  }
   0xf   :  { %89 = vperm.xlu2 %677, %v839_v5  }
  0x16   :  { %79 = vperm.xlu1 %679, %v827_v2   ;;  %94 = vperm.xlu0 %678, %v832_v3  }
  0x17   :  { %84 = vperm.xlu2 %677, %v848_v6  }
  0x1e   :  { %700 = vset.pattern.permute.xlu1 %v774_v48  ;;  %702 = vset.pattern.permute.xlu0 %v774_v48 }
  0x1f   :  { %701 = vset.pattern.permute.xlu2 %v774_v48 }
  0x61   :  { %v57_v10 = vpop.permute.xlu2 %56 }
  0x69   :  { %v90_v20 = vpop.permute.xlu2 %89 }
  0x71   :  { %v85_v29 = vpop.permute.xlu2 %84 }
  0x78   :  { %v48_v7 = vpop.permute.xlu1 %47  ;;  %v61_v8 = vpop.permute.xlu0 %60 }
  0x79   :  { %v51_v16 = vsel %vm50_vm0, %v43_v1, %v48_v7 }
  0x80   :  { %v64_v9 = vpop.permute.xlu0 %63  ;;  %v54_v11 = vpop.permute.xlu1 %53 }
  0x81   :  { %v66_v12 = vsel %vm50_vm0, %v61_v8, %v64_v9  ;;  %v59_v14 = vsel %vm50_vm0, %v54_v11, %v57_v10 }
  0x82   :  { %v68_v13 = vpack.c.bf16 %v66_v12, %v66_v12  ;;  %v67_v17 = vpack.c.bf16 %v59_v14, %v51_v16 }
  0x84   :  { %v116_v15 = vsel %vm114_vm1, %v68_v13, 0 }
  0x85   :  { %124 = vmatpush.bf16.msra.mxu0 %v116_v15  ;;  %655 = vmatpush.bf16.msra.mxu1 %v116_v15 }
  0x88   :  { %v80_v21 = vpop.permute.xlu1 %79  ;;  %v95_v28 = vpop.permute.xlu0 %94 }
  0x89   :  { %125 = vmatpush.bf16.msra.mxu0 %v67_v17  ;;  %656 = vmatpush.bf16.msra.mxu1 %v67_v17 }
  0x8c   :  { %589 = vmatmul.msk.bf16.vlgmr.msra.gmra.mxu0 %vm107_vm2, %v644_v18  ;;  %590 = vmatmul.msk.bf16.vlgmr.msra.gmra.mxu1 %vm107_vm2, %v645_v19  ;;  %v646_v18 = vld [vmem:[%s1023_s2] sm:$0xff]  ;;  %v647_v19 = vld [vmem:[%s1023_s2 + $0x8] sm:$0xff] }
 0x109   :  { %v127_v22 = vpop.f32.mrf.mxu0  ;;  %v132_v23 = vpop.f32.mrf.mxu1 }
 0x10a   :  { %v133_v24 = vadd.f32 %v132_v23, %v90_v20  ;;  %v128_v25 = vadd.f32 %v127_v22, %v80_v21 }
 0x10c   :  { %v859_v26 = vmax.f32 %v133_v24, 0.0  ;;  %v861_v27 = vmax.f32 %v128_v25, 0.0 }
 0x10e   :  { %161 = vrot.lane.b32.xlu1 %v859_v26, %s770_s23  ;;  %149 = vrot.lane.b32.xlu2 %v859_v26, %s771_s1 }
 0x10f   :  { %145 = vrot.lane.b32.xlu0 %v861_v27, %s771_s1 }
 0x111   :  { %v129_v30 = vpop.f32.mrf.mxu0  ;;  %v134_v31 = vpop.f32.mrf.mxu1 }
 0x112   :  { %v130_v32 = vadd.f32 %v129_v30, %v85_v29  ;;  %v135_v33 = vadd.f32 %v134_v31, %v95_v28 }
 0x114   :  { %v867_v34 = vmax.f32 %v130_v32, 0.0  ;;  %v140_v35 = vmax.f32 %v135_v33, 0.0 }
 0x116   :  { %v680_v36 = vpack.i.bf16 %v140_v35, %v859_v26  ;;  %v690_v37 = vpack.i.bf16 %v867_v34, %v861_v27 }
 0x118   :  { %681 = vrot.lane.b32.xlu1 %v680_v36, %s772_s24  ;;  %686 = vrot.lane.b32.xlu2 %v680_v36, %s773_s25 }
 0x119   :  { %691 = vrot.lane.b32.xlu0 %v690_v37, %s772_s24 }
 0x120   :  { %163 = vrot.lane.b32.xlu2 %v140_v35, %s770_s23  ;;  %696 = vrot.lane.b32.xlu1 %v690_v37, %s773_s25 }
 0x121   :  { %151 = vrot.lane.b32.xlu0 %v140_v35, %s771_s1 }
 0x128   :  { %157 = vrot.lane.b32.xlu2 %v861_v27, %s770_s23  ;;  %147 = vrot.lane.b32.xlu1 %v867_v34, %s771_s1 }
 0x129   :  { %159 = vrot.lane.b32.xlu0 %v867_v34, %s770_s23 }
 0x130   :  { %224 = vperm.xlu1 %700, %v839_v5   ;;  %228 = vperm.xlu2 %701, %v832_v3  }
 0x131   :  { %216 = vperm.xlu0 %702, %v827_v2  }
 0x138   :  { %220 = vperm.xlu1 %700, %v848_v6  }
 0x168   :  { %v150_v38 = vpop.permute.xlu2 %149 }
 0x172   :  { %v687_v41 = vpop.permute.xlu2 %686 }
 0x173   :  { %v689_v42 = vunpack.i.h.bf16 %v687_v41  ;;  %v688_v44 = vunpack.i.l.bf16 %v687_v41 }
 0x17a   :  { %v164_v52 = vpop.permute.xlu2 %163 }
 0x180   :  { %v162_v40 = vpop.permute.xlu1 %161 }
 0x181   :  { %v146_v39 = vpop.permute.xlu0 %145  ;;  %v890_v63 = vsel %vm107_vm2, %v150_v38, %v162_v40  ;;  %v649_v40 = vld [vmem:[%s1024_s3 + $0x8] sm:$0xff] }
 0x182   :  { %v158_v0 = vpop.permute.xlu2 %157 }
 0x183   :  { %v169_v10 = vsel %vm107_vm2, %v146_v39, %v158_v0  ;;  %v648_v39 = vld [vmem:[%s1024_s3] sm:$0xff] }
 0x18a   :  { %v682_v43 = vpop.permute.xlu1 %681  ;;  %v229_v25 = vpop.permute.xlu2 %228 }
 0x18b   :  { %v684_v45 = vunpack.i.h.bf16 %v682_v43  ;;  %v683_v46 = vunpack.i.l.bf16 %v682_v43  ;;  %v692_v47 = vpop.permute.xlu0 %691 }
 0x18c   :  { %v694_v54 = vunpack.i.h.bf16 %v692_v47  ;;  %v693_v55 = vunpack.i.l.bf16 %v692_v47 }
 0x18d   :  { %v207_v49 = vsel %vm107_vm2, %v683_v46, %v688_v44  ;;  %v208_v50 = vsel %vm107_vm2, %v684_v45, %v689_v42  ;;  %v191_v12 = vsel %vm107_vm2, %v859_v26, %v683_v46  ;;  %v192_v13 = vsel %vm107_vm2, %v140_v35, %v684_v45 }
 0x18e   :  { %v214_v51 = vpack.c.bf16 %v208_v50, %v207_v49  ;;  %v210_v14 = vpack.c.bf16 %v192_v13, %v191_v12  ;;  %v189_v15 = vsel %vm107_vm2, %v861_v27, %v693_v55  ;;  %v190_v16 = vsel %vm107_vm2, %v867_v34, %v694_v54 }
 0x18f   :  { %v209_v17 = vpack.c.bf16 %v190_v16, %v189_v15  ;;  %v775_v27 = vmov 2  }
 0x190   :  { %250 = vmatpush.bf16.msrb.mxu1 %v214_v51  ;;  %705 = vset.pattern.permute.xlu0 %v775_v27 }
 0x191   :  { %703 = vset.pattern.permute.xlu2 %v775_v27  ;;  %282 = vperm.xlu0 %705, %v848_v6  }
 0x192   :  { %v697_v53 = vpop.permute.xlu1 %696  ;;  %286 = vperm.xlu2 %703, %v839_v5   ;;  %704 = vset.pattern.permute.xlu1 %v775_v27 }
 0x193   :  { %v699_v56 = vunpack.i.h.bf16 %v697_v53  ;;  %v698_v57 = vunpack.i.l.bf16 %v697_v53  ;;  %v152_v58 = vpop.permute.xlu0 %151  ;;  %290 = vperm.xlu1 %704, %v832_v3  }
 0x194   :  { %v887_v62 = vsel %vm107_vm2, %v152_v58, %v164_v52 }
 0x195   :  { %v205_v59 = vsel %vm107_vm2, %v693_v55, %v698_v57  ;;  %v206_v60 = vsel %vm107_vm2, %v694_v54, %v699_v56  ;;  %v212_v7 = vpack.c.bf16 %v887_v62, %v890_v63 }
 0x196   :  { %v213_v61 = vpack.c.bf16 %v206_v60, %v205_v59 }
 0x198   :  { %251 = vmatpush.bf16.msrb.mxu1 %v213_v61 }
 0x19a   :  { %v148_v1 = vpop.permute.xlu1 %147  ;;  %278 = vperm.xlu2 %703, %v827_v2  }
 0x19b   :  { %v160_v8 = vpop.permute.xlu0 %159 }
 0x19c   :  { %v170_v9 = vsel %vm107_vm2, %v148_v1, %v160_v8  ;;  %252 = vmatpush.bf16.msrb.mxu1 %v212_v7 }
 0x19d   :  { %v211_v11 = vpack.c.bf16 %v170_v9, %v169_v10 }
 0x1a0   :  { %253 = vmatpush.bf16.msrb.mxu1 %v211_v11 }
 0x1a2   :  { %v225_v22 = vpop.permute.xlu1 %224 }
 0x1a3   :  { %v217_v28 = vpop.permute.xlu0 %216 }
 0x1a4   :  { %254 = vmatpush.bf16.msrb.mxu1 %v210_v14 }
 0x1a8   :  { %255 = vmatpush.bf16.msrb.mxu1 %v209_v17 }
 0x1aa   :  { %v221_v24 = vpop.permute.xlu1 %220 }
 0x1ab   :  { %599 = vmatmul.msk.bf16.vlgmr.msrb.gmra.mxu1 %vm241_vm3, %v646_v18 }
 0x1bb   :  { %600 = vmatmul.msk.bf16.gmra.mxu1 %vm241_vm3, %v647_v19 }
 0x1ec   :  { %v287_v41 = vpop.permute.xlu2 %286 }
 0x1f4   :  { %v279_v43 = vpop.permute.xlu2 %278 }
 0x203   :  { %v283_v45 = vpop.permute.xlu0 %282 }
 0x205   :  { %v291_v57 = vpop.permute.xlu1 %290 }
 0x228   :  { %v257_v20 = vpop.f32.mrf.mxu1 }
 0x229   :  { %v258_v32 = vadd.f32 %v257_v20, %v217_v28 }
 0x22b   :  { %v267_v37 = vmax.f32 %v258_v32, 0.0 }
 0x230   :  { %v259_v21 = vpop.f32.mrf.mxu1 }
 0x231   :  { %v260_v30 = vadd.f32 %v259_v21, %v221_v24  ;;  %v779_v24 = vmov 3  }
 0x232   :  { %728 = vset.pattern.permute.xlu1 %v779_v24  ;;  %726 = vset.pattern.permute.xlu2 %v779_v24 }
 0x233   :  { %v268_v35 = vmax.f32 %v260_v30, 0.0  ;;  %727 = vset.pattern.permute.xlu0 %v779_v24 }
 0x235   :  { %v275_v38 = vpack.c.bf16 %v268_v35, %v267_v37 }
 0x238   :  { %v262_v23 = vpop.f32.mrf.mxu1 }
 0x239   :  { %v263_v26 = vadd.f32 %v262_v23, %v225_v22 }
 0x23b   :  { %v269_v33 = vmax.f32 %v263_v26, 0.0 }
 0x240   :  { %v264_v29 = vpop.f32.mrf.mxu1 }
 0x241   :  { %v265_v31 = vadd.f32 %v264_v29, %v229_v25 }
 0x243   :  { %v270_v34 = vmax.f32 %v265_v31, 0.0 }
 0x245   :  { %v276_v36 = vpack.c.bf16 %v270_v34, %v269_v33 }
 0x247   :  { %316 = vmatpush.bf16.msra.mxu2 %v276_v36 }
 0x24b   :  { %317 = vmatpush.bf16.msra.mxu2 %v275_v38 }
 0x24e   :  { %609 = vmatmul.msk.bf16.vlgmr.msra.gmra.mxu2 %vm303_vm4, %v648_v39 }
 0x25e   :  { %610 = vmatmul.msk.bf16.gmra.mxu2 %vm303_vm4, %v649_v40 }
 0x2d1   :  { %v319_v42 = vpop.f32.mrf.mxu2 }
 0x2d2   :  { %v320_v44 = vadd.f32 %v319_v42, %v279_v43  ;;  %v650_v43 = vld [vmem:[%s1023_s2 + $0x10] sm:$0xff] }
 0x2d4   :  { %v329_v47 = vmax.f32 %v320_v44, 0.0  ;;  %v651_v44 = vld [vmem:[%s1023_s2 + $0x18] sm:$0xff] }
 0x2d6   :  { %v923_v50 = vadd.f32 %v329_v47, %v169_v10 }
 0x2d9   :  { %v321_v46 = vpop.f32.mrf.mxu2 }
 0x2da   :  { %v322_v48 = vadd.f32 %v321_v46, %v283_v45  ;;  %v780_v46 = vmov 4  }
 0x2dc   :  { %v330_v49 = vmax.f32 %v322_v48, 0.0 }
 0x2de   :  { %v925_v51 = vadd.f32 %v330_v49, %v170_v9 }
 0x2e0   :  { %v711_v52 = vpack.i.bf16 %v925_v51, %v923_v50 }
 0x2e1   :  { %v324_v53 = vpop.f32.mrf.mxu2 }
 0x2e2   :  { %v325_v54 = vadd.f32 %v324_v53, %v287_v41  ;;  %712 = vrot.lane.b32.xlu2 %v711_v52, %s776_s11  ;;  %707 = vrot.lane.b32.xlu1 %v711_v52, %s777_s0 }
 0x2e4   :  { %v331_v55 = vmax.f32 %v325_v54, 0.0 }
 0x2e6   :  { %v930_v56 = vadd.f32 %v331_v55, %v890_v63 }
 0x2e8   :  { %345 = vrot.lane.b32.xlu0 %v930_v56, %s770_s23 }
 0x2e9   :  { %v326_v58 = vpop.f32.mrf.mxu2 }
 0x2ea   :  { %v327_v59 = vadd.f32 %v326_v58, %v291_v57 }
 0x2ec   :  { %v332_v60 = vmax.f32 %v327_v59, 0.0 }
 0x2ee   :  { %v336_v61 = vadd.f32 %v332_v60, %v887_v62  ;;  %v652_v60 = vld [vmem:[%s1024_s3 + $0x10] sm:$0xff] }
 0x2f0   :  { %359 = vrot.lane.b32.xlu0 %v336_v61, %s778_s12  ;;  %v721_v0 = vpack.i.bf16 %v336_v61, %v930_v56 }
 0x2f2   :  { %722 = vrot.lane.b32.xlu2 %v721_v0, %s776_s11  ;;  %717 = vrot.lane.b32.xlu1 %v721_v0, %s777_s0 }
 0x2f8   :  { %353 = vrot.lane.b32.xlu0 %v923_v50, %s778_s12 }
 0x2fa   :  { %357 = vrot.lane.b32.xlu2 %v930_v56, %s778_s12  ;;  %341 = vrot.lane.b32.xlu1 %v923_v50, %s770_s23 }
 0x300   :  { %426 = vperm.xlu0 %727, %v832_v3  }
 0x302   :  { %343 = vrot.lane.b32.xlu2 %v925_v51, %s770_s23  ;;  %347 = vrot.lane.b32.xlu1 %v336_v61, %s770_s23 }
 0x308   :  { %731 = vset.pattern.permute.xlu0 %v780_v46 }
 0x309   :  { %476 = vperm.xlu0 %731, %v827_v2  }
 0x30a   :  { %355 = vrot.lane.b32.xlu1 %v925_v51, %s778_s12  ;;  %422 = vperm.xlu2 %726, %v839_v5  }
 0x311   :  { %734 = vset.pattern.permute.xlu0 %v769_v4 }
 0x312   :  { %414 = vperm.xlu1 %728, %v827_v2   ;;  %418 = vperm.xlu2 %726, %v848_v6  }
 0x31a   :  { %729 = vset.pattern.permute.xlu1 %v780_v46  ;;  %730 = vset.pattern.permute.xlu2 %v780_v46 }
 0x31b   :  { %484 = vperm.xlu1 %729, %v839_v5   ;;  %488 = vperm.xlu2 %730, %v832_v3  }
 0x323   :  { %480 = vperm.xlu1 %729, %v848_v6   ;;  %732 = vset.pattern.permute.xlu2 %v769_v4 }
 0x32b   :  { %733 = vset.pattern.permute.xlu1 %v769_v4  ;;  %v653_v4 = vld [vmem:[%s1024_s3 + $0x18] sm:$0xff] }
 0x33c   :  { %v713_v62 = vpop.permute.xlu2 %712 }
 0x33d   :  { %v715_v14 = vunpack.i.h.bf16 %v713_v62  ;;  %v714_v15 = vunpack.i.l.bf16 %v713_v62  ;;  %v539_v62 = vld [vmem:[%s1027_s6 + $0x8] sm:$0xf] }
 0x33e   :  { %547 = vperm.xlu1 %733, %v539_v62  }
 0x34c   :  { %v723_v1 = vpop.permute.xlu2 %722 }
 0x34d   :  { %v725_v7 = vunpack.i.h.bf16 %v723_v1  ;;  %v724_v8 = vunpack.i.l.bf16 %v723_v1 }
 0x354   :  { %v708_v63 = vpop.permute.xlu1 %707  ;;  %v358_v25 = vpop.permute.xlu2 %357 }
 0x355   :  { %v710_v10 = vunpack.i.h.bf16 %v708_v63  ;;  %v709_v11 = vunpack.i.l.bf16 %v708_v63  ;;  %v538_v63 = vld [vmem:[%s1027_s6] sm:$0xff] }
 0x356   :  { %542 = vperm.xlu2 %732, %v538_v63  }
 0x357   :  { %v403_v20 = vsel %vm365_vm5, %v709_v11, %v714_v15  ;;  %v404_v21 = vsel %vm365_vm5, %v710_v10, %v715_v14  ;;  %v387_v40 = vsel %vm365_vm5, %v923_v50, %v709_v11  ;;  %v388_v41 = vsel %vm365_vm5, %v925_v51, %v710_v10 }
 0x358   :  { %v411_v23 = vpack.c.bf16 %v404_v21, %v403_v20  ;;  %v407_v42 = vpack.c.bf16 %v388_v41, %v387_v40 }
 0x35a   :  { %v346_v18 = vpop.permute.xlu0 %345 }
 0x35b   :  { %v952_v28 = vsel %vm365_vm5, %v346_v18, %v358_v25  ;;  %v641_v25 = vld [vmem:[%s1025_s4] sm:$0xf] }
 0x35c   :  { %v344_v31 = vpop.permute.xlu2 %343 }
 0x362   :  { %v360_v26 = vpop.permute.xlu0 %359 }
 0x364   :  { %v718_v9 = vpop.permute.xlu1 %717  ;;  %v423_v48 = vpop.permute.xlu2 %422 }
 0x365   :  { %v720_v12 = vunpack.i.h.bf16 %v718_v9  ;;  %v719_v13 = vunpack.i.l.bf16 %v718_v9 }
 0x367   :  { %v405_v16 = vsel %vm365_vm5, %v719_v13, %v724_v8  ;;  %v406_v17 = vsel %vm365_vm5, %v720_v12, %v725_v7  ;;  %v389_v37 = vsel %vm365_vm5, %v930_v56, %v719_v13  ;;  %v390_v38 = vsel %vm365_vm5, %v336_v61, %v720_v12 }
 0x368   :  { %v412_v19 = vpack.c.bf16 %v406_v17, %v405_v16  ;;  %v408_v39 = vpack.c.bf16 %v390_v38, %v389_v37 }
 0x36a   :  { %447 = vmatpush.bf16.msra.mxu3 %v412_v19  ;;  %v354_v32 = vpop.permute.xlu0 %353 }
 0x36c   :  { %v342_v22 = vpop.permute.xlu1 %341  ;;  %v419_v50 = vpop.permute.xlu2 %418 }
 0x36d   :  { %v961_v34 = vsel %vm365_vm5, %v342_v22, %v354_v32 }
 0x36e   :  { %448 = vmatpush.bf16.msra.mxu3 %v411_v23 }
 0x372   :  { %v427_v51 = vpop.permute.xlu0 %426 }
 0x374   :  { %v348_v27 = vpop.permute.xlu1 %347 }
 0x375   :  { %v955_v29 = vsel %vm365_vm5, %v348_v27, %v360_v26  ;;  %v489_v11 = vpop.permute.xlu2 %488  ;;  %v654_v26 = vld [vmem:[%s1025_s4] sm:$0x30] }
 0x376   :  { %v410_v30 = vpack.c.bf16 %v955_v29, %v952_v28 }
 0x378   :  { %449 = vmatpush.bf16.msra.mxu3 %v410_v30  ;;  %v642_v30 = vor.u32 %v654_v26, %v641_v25 }
 0x37b   :  { %v477_v10 = vpop.permute.xlu0 %476 }
 0x37c   :  { %v356_v33 = vpop.permute.xlu1 %355 }
 0x37d   :  { %v964_v35 = vsel %vm365_vm5, %v344_v31, %v356_v33 }
 0x37e   :  { %v409_v36 = vpack.c.bf16 %v964_v35, %v961_v34 }
 0x380   :  { %450 = vmatpush.bf16.msra.mxu3 %v409_v36 }
 0x384   :  { %451 = vmatpush.bf16.msra.mxu3 %v408_v39  ;;  %v415_v53 = vpop.permute.xlu1 %414 }
 0x388   :  { %452 = vmatpush.bf16.msra.mxu3 %v407_v42 }
 0x38b   :  { %623 = vmatmul.msk.bf16.vlgmr.msra.gmra.mxu3 %vm241_vm3, %v650_v43 }
 0x38d   :  { %v485_v1 = vpop.permute.xlu1 %484 }
 0x395   :  { %v481_v8 = vpop.permute.xlu1 %480 }
 0x39b   :  { %624 = vmatmul.msk.bf16.gmra.mxu3 %vm241_vm3, %v651_v44 }
 0x3b0   :  { %v548_v32 = vpop.permute.xlu1 %547 }
 0x40e   :  { %v454_v45 = vpop.f32.mrf.mxu3 }
 0x40f   :  { %v455_v55 = vadd.f32 %v454_v45, %v415_v53 }
 0x411   :  { %v464_v59 = vmax.f32 %v455_v55, 0.0 }
 0x416   :  { %v456_v47 = vpop.f32.mrf.mxu3 }
 0x417   :  { %v457_v2 = vadd.f32 %v456_v47, %v419_v50 }
 0x419   :  { %v465_v57 = vmax.f32 %v457_v2, 0.0 }
 0x41b   :  { %v473_v6 = vpack.c.bf16 %v465_v57, %v464_v59 }
 0x41e   :  { %v459_v49 = vpop.f32.mrf.mxu3 }
 0x41f   :  { %v460_v52 = vadd.f32 %v459_v49, %v423_v48 }
 0x421   :  { %v466_v56 = vmax.f32 %v460_v52, 0.0 }
 0x426   :  { %v461_v54 = vpop.f32.mrf.mxu3 }
 0x427   :  { %v462_v5 = vadd.f32 %v461_v54, %v427_v51 }
 0x429   :  { %v467_v3 = vmax.f32 %v462_v5, 0.0 }
 0x42b   :  { %v474_v58 = vpack.c.bf16 %v467_v3, %v466_v56 }
 0x42d   :  { %513 = vmatpush.bf16.msrb.mxu0 %v474_v58 }
 0x431   :  { %514 = vmatpush.bf16.msrb.mxu0 %v473_v6 }
 0x434   :  { %637 = vmatmul.msk.bf16.vlgmr.msrb.gmra.mxu0 %vm303_vm4, %v652_v60 }
 0x444   :  { %638 = vmatmul.msk.bf16.gmra.mxu0 %vm303_vm4, %v653_v4 }
 0x4b1   :  { %v516_v61 = vpop.f32.mrf.mxu0 }
 0x4b2   :  { %v517_v14 = vadd.f32 %v516_v61, %v477_v10 }
 0x4b4   :  { %v526_v19 = vmax.f32 %v517_v14, 0.0 }
 0x4b6   :  { %v530_v24 = vadd.f32 %v526_v19, %v961_v34 }
 0x4b9   :  { %v518_v0 = vpop.f32.mrf.mxu0 }
 0x4ba   :  { %v519_v12 = vadd.f32 %v518_v0, %v481_v8 }
 0x4bc   :  { %v527_v17 = vmax.f32 %v519_v12, 0.0 }
 0x4be   :  { %v531_v22 = vadd.f32 %v527_v17, %v964_v35 }
 0x4c0   :  { %v536_v27 = vpack.c.bf16 %v531_v22, %v530_v24 }
 0x4c1   :  { %v521_v7 = vpop.f32.mrf.mxu0 }
 0x4c2   :  { %v522_v9 = vadd.f32 %v521_v7, %v485_v1 }
 0x4c4   :  { %v528_v15 = vmax.f32 %v522_v9, 0.0 }
 0x4c6   :  { %v532_v20 = vadd.f32 %v528_v15, %v952_v28  ;;  %v543_v28 = vpop.permute.xlu2 %542 }
 0x4c9   :  { %v523_v13 = vpop.f32.mrf.mxu0 }
 0x4ca   :  { %v524_v16 = vadd.f32 %v523_v13, %v489_v11 }
 0x4cc   :  { %v529_v18 = vmax.f32 %v524_v16, 0.0 }
 0x4ce   :  { %v533_v21 = vadd.f32 %v529_v18, %v955_v29 }
 0x4d0   :  { %v537_v23 = vpack.c.bf16 %v533_v21, %v532_v20 }
 0x4d2   :  { %564 = vmatpush.bf16.msrb.mxu2 %v537_v23 }
 0x4d6   :  { %565 = vmatpush.bf16.msrb.mxu2 %v536_v27 }
 0x4d9   :  { %643 = vmatmul.msk.bf16.vlgmr.msrb.gmra.mxu2 %vm303_vm4, %v642_v30 }
 0x55c   :  { %v567_v29 = vpop.f32.mrf.mxu2 }
 0x55d   :  { %v568_v31 = vadd.f32 %v567_v29, %v543_v28 }
 0x55f   :  { %573 = vst.msk [vmem:[%s1028_s7] sm:$0xff] %vm572_vm6, %v568_v31 }
 0x564   :  { %v569_v33 = vpop.f32.mrf.mxu2 }
 0x565   :  { %v570_v34 = vadd.f32 %v569_v33, %v548_v32 }
 0x567   :  { %575 = vst.msk [vmem:[%s1028_s7 + $0x8] sm:$0xf] %vm574_vm7, %v570_v34 }
 0x568   :  { %580 = vsyncpa [#allocation3], 1 }

</bundles_post_ra>
